<compile_context>
chip_gen: v6e
topology: v6e:2x2x1
jax: 0.10.0
libtpu: 0.0.40
codegen_flags: <defaults>
</compile_context>

<pallas_src>
import jax
import jax.numpy as jnp
from jax.experimental import pallas as pl
from jax.experimental.pallas import tpu as pltpu


def dqn_kernel(x_ref, w1_ref, b1_ref, w2_ref, b2_ref, w3_ref, b3_ref, o_ref):
    # x_ref: (in_dim, Bt)   -- batch on the lane axis
    # wN_ref: (out_N, in_N) -- PyTorch nn.Linear weight layout
    # bN_ref: (out_N, 1)    -- f32, broadcasts over the batch lanes
    x = x_ref[...]

    # fc1 + ReLU
    h1 = jnp.dot(w1_ref[...], x, preferred_element_type=jnp.float32)
    h1 = jnp.maximum(h1 + b1_ref[...], 0.0)

    # fc2 + ReLU
    h2 = jnp.dot(w2_ref[...], h1.astype(w2_ref.dtype),
                 preferred_element_type=jnp.float32)
    h2 = jnp.maximum(h2 + b2_ref[...], 0.0)

    # fc3 (no activation)
    out = jnp.dot(w3_ref[...], h2.astype(w3_ref.dtype),
                  preferred_element_type=jnp.float32)
    o_ref[...] = (out + b3_ref[...]).astype(o_ref.dtype)


def dqn_forward(x, params, *, block_b=512, compute_dtype=jnp.bfloat16):
    """Fused DQN forward pass.

    x: (B, input_dim) f32.  params: (w1, b1, w2, b2, w3, b3) with
    w_i shaped (out_i, in_i) (PyTorch layout) and b_i shaped (out_i, 1), f32.
    Returns (B, output_dim) f32 == fc3(relu(fc2(relu(fc1(x))))).
    """
    w1, b1, w2, b2, w3, b3 = params
    B, in_dim = x.shape
    out_dim = w3.shape[0]

    # Batch tile: multiple of 128 (lane width), capped at block_b.
    bt = min(block_b, pl.cdiv(B, 128) * 128)
    padded_b = pl.cdiv(B, bt) * bt
    num_blocks = padded_b // bt

    # Transpose so batch is on lanes; pad batch to a full number of tiles.
    x_t = jnp.pad(x, ((0, padded_b - B), (0, 0))).T.astype(compute_dtype)
    w1c = w1.astype(compute_dtype)
    w2c = w2.astype(compute_dtype)
    w3c = w3.astype(compute_dtype)

    def const_spec(a):
        # Full-array block, same block every grid step -> stays VMEM-resident.
        return pl.BlockSpec(a.shape, lambda i: (0,) * a.ndim)

    out_t = pl.pallas_call(
        dqn_kernel,
        out_shape=jax.ShapeDtypeStruct((out_dim, padded_b), jnp.float32),
        grid=(num_blocks,),
        in_specs=[
            pl.BlockSpec((in_dim, bt), lambda i: (0, i)),   # x tile
            const_spec(w1c), const_spec(b1),
            const_spec(w2c), const_spec(b2),
            const_spec(w3c), const_spec(b3),
        ],
        out_specs=pl.BlockSpec((out_dim, bt), lambda i: (0, i)),
        compiler_params=pltpu.CompilerParams(
            dimension_semantics=("parallel",)),
    )(x_t, w1c, b1, w2c, b2, w3c, b3)

    # Drop batch padding and return the conventional (B, out_dim) layout.
    return out_t[:, :B].T.astype(x.dtype)


def init_params(key, input_dim, output_dim):
    """nn.Linear-style init: U(-1/sqrt(fan_in), 1/sqrt(fan_in)), PyTorch layout."""
    dims = [(input_dim, 50), (50, 25), (25, output_dim)]
    params = []
    for fan_in, fan_out in dims:
        key, kw, kb = jax.random.split(key, 3)
        bound = 1.0 / jnp.sqrt(float(fan_in))
        w = jax.random.uniform(kw, (fan_out, fan_in), jnp.float32, -bound, bound)
        b = jax.random.uniform(kb, (fan_out, 1), jnp.float32, -bound, bound)
        params.extend([w, b])
    return tuple(params)


def reference_forward(x, params):
    w1, b1, w2, b2, w3, b3 = params
    h1 = jnp.maximum(x @ w1.T + b1[:, 0], 0.0)
    h2 = jnp.maximum(h1 @ w2.T + b2[:, 0], 0.0)
    return h2 @ w3.T + b3[:, 0]


if __name__ == "__main__":
    key = jax.random.PRNGKey(0)
    key, kx, kp = jax.random.split(key, 3)

    batch = 256          # multi-tile grid with block_b=128 below
    input_dim = 32
    output_dim = 4

    x = jax.random.normal(kx, (batch, input_dim), jnp.float32)
    params = init_params(kp, input_dim, output_dim)
    ref = reference_forward(x, params)

    # f32 compute path: tight numerical check of the kernel structure.
    out_f32 = dqn_forward(x, params, block_b=128, compute_dtype=jnp.float32)
    jax.block_until_ready(out_f32)
    assert out_f32.shape == (batch, output_dim)
    assert jnp.allclose(out_f32, ref, atol=1e-4, rtol=1e-4)

    # bf16 compute path (the performance configuration): looser tolerance.
    out_bf16 = dqn_forward(x, params, block_b=128, compute_dtype=jnp.bfloat16)
    jax.block_until_ready(out_bf16)
    assert out_bf16.shape == (batch, output_dim)
    assert jnp.allclose(out_bf16, ref, atol=1e-1, rtol=1e-1)

    print("KERNEL_OK")
</pallas_src>

<mosaic_0001>
module attributes {stable_mosaic.version = 11 : i64} {
  func.func @dqn_kernel(%arg0: i32, %arg1: memref<32x128xf32, #tpu.memory_space<vmem>>, %arg2: memref<50x32xf32, #tpu.memory_space<vmem>>, %arg3: memref<50x1xf32, #tpu.memory_space<vmem>>, %arg4: memref<25x50xf32, #tpu.memory_space<vmem>>, %arg5: memref<25x1xf32, #tpu.memory_space<vmem>>, %arg6: memref<4x25xf32, #tpu.memory_space<vmem>>, %arg7: memref<4x1xf32, #tpu.memory_space<vmem>>, %arg8: memref<4x128xf32, #tpu.memory_space<vmem>>) attributes {dimension_semantics = [#tpu.dimension_semantics<parallel>], iteration_bounds = array<i64: 2>, scalar_prefetch = 0 : i64, scratch_operands = 0 : i64, tpu.core_type = #tpu.core_type<tc>, window_params = [{transform_indices = @transform_0, window_bounds = array<i64: 32, 128>}, {pipeline_mode = #tpu.pipeline_mode<synchronous>, transform_indices = @transform_1, window_bounds = array<i64: 50, 32>}, {pipeline_mode = #tpu.pipeline_mode<synchronous>, transform_indices = @transform_2, window_bounds = array<i64: 50, 1>}, {pipeline_mode = #tpu.pipeline_mode<synchronous>, transform_indices = @transform_3, window_bounds = array<i64: 25, 50>}, {pipeline_mode = #tpu.pipeline_mode<synchronous>, transform_indices = @transform_4, window_bounds = array<i64: 25, 1>}, {pipeline_mode = #tpu.pipeline_mode<synchronous>, transform_indices = @transform_5, window_bounds = array<i64: 4, 25>}, {pipeline_mode = #tpu.pipeline_mode<synchronous>, transform_indices = @transform_6, window_bounds = array<i64: 4, 1>}, {transform_indices = @transform_7, window_bounds = array<i64: 4, 128>}]} {
    %c0 = arith.constant 0 : index
    %c0_0 = arith.constant 0 : index
    %0 = vector.load %arg1[%c0, %c0_0] : memref<32x128xf32, #tpu.memory_space<vmem>>, vector<32x128xf32>
    %c0_1 = arith.constant 0 : index
    %c0_2 = arith.constant 0 : index
    %1 = vector.load %arg2[%c0_1, %c0_2] : memref<50x32xf32, #tpu.memory_space<vmem>>, vector<50x32xf32>
    %cst = arith.constant dense<0.000000e+00> : vector<50x128xf32>
    %2 = tpu.matmul %1, %0, %cst {dimension_numbers = #tpu.dot_dimension_numbers<[1], [0], [0], [1], [0, 0, 1, 1], [], []>} : vector<50x32xf32>, vector<32x128xf32>, vector<50x128xf32> -> vector<50x128xf32>
    %c0_3 = arith.constant 0 : index
    %c0_4 = arith.constant 0 : index
    %3 = vector.load %arg3[%c0_3, %c0_4] : memref<50x1xf32, #tpu.memory_space<vmem>>, vector<50x1xf32>
    %4 = vector.broadcast %3 : vector<50x1xf32> to vector<50x128xf32>
    %5 = arith.addf %2, %4 : vector<50x128xf32>
    %cst_5 = arith.constant 0.000000e+00 : f32
    %6 = vector.broadcast %cst_5 : f32 to vector<50x128xf32>
    %7 = arith.maximumf %5, %6 : vector<50x128xf32>
    %c0_6 = arith.constant 0 : index
    %c0_7 = arith.constant 0 : index
    %8 = vector.load %arg4[%c0_6, %c0_7] : memref<25x50xf32, #tpu.memory_space<vmem>>, vector<25x50xf32>
    %cst_8 = arith.constant dense<0.000000e+00> : vector<25x128xf32>
    %9 = tpu.matmul %8, %7, %cst_8 {dimension_numbers = #tpu.dot_dimension_numbers<[1], [0], [0], [1], [0, 0, 1, 1], [], []>} : vector<25x50xf32>, vector<50x128xf32>, vector<25x128xf32> -> vector<25x128xf32>
    %c0_9 = arith.constant 0 : index
    %c0_10 = arith.constant 0 : index
    %10 = vector.load %arg5[%c0_9, %c0_10] : memref<25x1xf32, #tpu.memory_space<vmem>>, vector<25x1xf32>
    %11 = vector.broadcast %10 : vector<25x1xf32> to vector<25x128xf32>
    %12 = arith.addf %9, %11 : vector<25x128xf32>
    %cst_11 = arith.constant 0.000000e+00 : f32
    %13 = vector.broadcast %cst_11 : f32 to vector<25x128xf32>
    %14 = arith.maximumf %12, %13 : vector<25x128xf32>
    %c0_12 = arith.constant 0 : index
    %c0_13 = arith.constant 0 : index
    %15 = vector.load %arg6[%c0_12, %c0_13] : memref<4x25xf32, #tpu.memory_space<vmem>>, vector<4x25xf32>
    %cst_14 = arith.constant dense<0.000000e+00> : vector<4x128xf32>
    %16 = tpu.matmul %15, %14, %cst_14 {dimension_numbers = #tpu.dot_dimension_numbers<[1], [0], [0], [1], [0, 0, 1, 1], [], []>} : vector<4x25xf32>, vector<25x128xf32>, vector<4x128xf32> -> vector<4x128xf32>
    %c0_15 = arith.constant 0 : index
    %c0_16 = arith.constant 0 : index
    %17 = vector.load %arg7[%c0_15, %c0_16] : memref<4x1xf32, #tpu.memory_space<vmem>>, vector<4x1xf32>
    %18 = vector.broadcast %17 : vector<4x1xf32> to vector<4x128xf32>
    %19 = arith.addf %16, %18 : vector<4x128xf32>
    %c0_17 = arith.constant 0 : index
    %c0_18 = arith.constant 0 : index
    %20 = vector.load %arg8[%c0_17, %c0_18] : memref<4x128xf32, #tpu.memory_space<vmem>>, vector<4x128xf32>
    tpu.vector_store %arg8[%c0_17, %c0_18], %19 {strides = array<i32>} : memref<4x128xf32, #tpu.memory_space<vmem>>, vector<4x128xf32>,
    return
  }
  func.func @transform_0(%arg0: i32) -> (i32, i32) {
    %c0_i32 = arith.constant 0 : i32
    %c0_i32_0 = arith.constant 0 : i32
    return %c0_i32, %arg0 : i32, i32
  }
  func.func @transform_1(%arg0: i32) -> (i32, i32) {
    %c0_i32 = arith.constant 0 : i32
    %c0_i32_0 = arith.constant 0 : i32
    %c0_i32_1 = arith.constant 0 : i32
    return %c0_i32, %c0_i32_0 : i32, i32
  }
  func.func @transform_2(%arg0: i32) -> (i32, i32) {
    %c0_i32 = arith.constant 0 : i32
    %c0_i32_0 = arith.constant 0 : i32
    %c0_i32_1 = arith.constant 0 : i32
    return %c0_i32, %c0_i32_0 : i32, i32
  }
  func.func @transform_3(%arg0: i32) -> (i32, i32) {
    %c0_i32 = arith.constant 0 : i32
    %c0_i32_0 = arith.constant 0 : i32
    %c0_i32_1 = arith.constant 0 : i32
    return %c0_i32, %c0_i32_0 : i32, i32
  }
  func.func @transform_4(%arg0: i32) -> (i32, i32) {
    %c0_i32 = arith.constant 0 : i32
    %c0_i32_0 = arith.constant 0 : i32
    %c0_i32_1 = arith.constant 0 : i32
    return %c0_i32, %c0_i32_0 : i32, i32
  }
  func.func @transform_5(%arg0: i32) -> (i32, i32) {
    %c0_i32 = arith.constant 0 : i32
    %c0_i32_0 = arith.constant 0 : i32
    %c0_i32_1 = arith.constant 0 : i32
    return %c0_i32, %c0_i32_0 : i32, i32
  }
  func.func @transform_6(%arg0: i32) -> (i32, i32) {
    %c0_i32 = arith.constant 0 : i32
    %c0_i32_0 = arith.constant 0 : i32
    %c0_i32_1 = arith.constant 0 : i32
    return %c0_i32, %c0_i32_0 : i32, i32
  }
  func.func @transform_7(%arg0: i32) -> (i32, i32) {
    %c0_i32 = arith.constant 0 : i32
    %c0_i32_0 = arith.constant 0 : i32
    return %c0_i32, %arg0 : i32, i32
  }
}

</mosaic_0001>

<bundles_post_ra>
// kernel: tpu_custom_call.1
= control target key start
LH: loop header
LB: loop body
LE: loop exit
PB: predicated region body
PF: predicated region fallthrough
CT: control target
= control target key end

     0   :  { %12 = vsyncpa [#allocation4], 0  ;;  %s1278_s0 = inlined_call_operand.vmem [shape: f32[32,256], index: 0, kind: input, shape index: {}]   ;;  %s1279_s1 = inlined_call_operand.vmem [shape: f32[50,32], index: 1, kind: input, shape index: {}]   ;;  %s1280_s2 = inlined_call_operand.vmem [shape: f32[50,1], index: 2, kind: input, shape index: {}]   ;;  %s1281_s3 = inlined_call_operand.vmem [shape: f32[25,50], index: 3, kind: input, shape index: {}]   ;;  %s1282_s4 = inlined_call_operand.vmem [shape: f32[25,1], index: 4, kind: input, shape index: {}]   ;;  %s1283_s5 = inlined_call_operand.vmem [shape: f32[4,25], index: 5, kind: input, shape index: {}]   ;;  %s1284_s6 = inlined_call_operand.vmem [shape: f32[4,1], index: 6, kind: input, shape index: {}]   ;;  %s1285_s7 = inlined_call_operand.hbm [shape: f32[4,256], index: 7, kind: output, shape index: {}]  }
   0x1   :  { %14 = vsyncpa [#allocation4 + $0x1], 0  ;;  %s1068_s24 = smov 0   ;;  %s1070_s25 = smov 0  }
   0x2   :  { %s1072_s26 = smov 0   ;;  %s1074_s27 = smov 0  }
   0x3 LB: > { %s804_s28 = sadd.s32 4294967295, %s1022_s27   ;;  %s805_s29 = sadd.s32 4294967294, %s1022_s27   ;;  %s1022_s27 = sphi %s1074_s27, %s1291_s27   ;;  %s1018_s26 = sphi %s1072_s26, %s1290_s26   ;;  %s1014_s25 = sphi %s1070_s25, %s1289_s25   ;;  %s1010_s24 = sphi %s1068_s24, %s1288_s24  }
   0x4   : > { %s1091_s30 = sadd.s32 1, %s1022_s27   ;;  %s27_s8 = sadd.s32 1, %s1018_s26 }
   0x5   : > { %s24_s9 = ssub.s32 %s1022_s27, %s1091_s30  ;;  %p34_p0 = scmp.ne.s32.totalorder %s1018_s26, %s1014_s25 }
   0x6   : > { %p25_p1 = scmp.eq.s32.totalorder %s24_s9, 0  ;;  %p35_p2 = scmp.eq.s32.totalorder %s1022_s27, 0 }
   0x7   : > { %p190_p3 = scmp.eq.s32.totalorder %s804_s28, 1  ;;  %p195_p4 = scmp.ne.s32.totalorder %s1014_s25, %s1010_s24 }
   0x8   : > { %s1104_s10 = scalar_select %p25_p1, %s1018_s26, %s27_s8  }
   0x9   : > { %p36_p5 = por %p35_p2, %p34_p0  ;;  %p1106_p6 = por %p190_p3, %p34_p0 }
   0xa   : > { %p196_p7 = scmp.eq.s32.totalorder %s805_s29, 1  ;;  %p807_p9 = scmp.ge.s32.totalorder %s1022_s27, 2 }
   0xc   : > { %p1110_p8 = por %p196_p7, %p195_p4  ;;  %230 = sbr.rel (%p807_p9) target bundleno = 23 (0x17), region = 40 }
  0x11   : > { %233 = sbr.rel (!%p36_p5) target bundleno = 23 (0x17), region = 44  ;;  %s235_s13 = sand.u32 (%p36_p5), 1, %s1018_s26  }
  0x12   : > { %s809_s14 = sshll.u32 (%p36_p5), %s1022_s27, 3  ;;  %s808_s15 = sshll.u32 (%p36_p5), %s235_s13, 5 }
  0x13   : > { %s239_s18 = scalar_lea.vmem (%p36_p5), %s1278_s0, %s809_s14  ;;  %s237_s19 = scalar_lea.vmem (%p36_p5), [#allocation2], %s808_s15 }
  0x14   : > { %v274_v0 = vld [vmem:[%s239_s18] sm:$0xff] (%p36_p5)  ;;  %v276_v1 = vld [vmem:[%s239_s18 + $0x10] sm:$0xff] (%p36_p5) }
  0x15   : > { %v278_v2 = vld [vmem:[%s239_s18 + $0x20] sm:$0xff] (%p36_p5)  ;;  %275 = vst [vmem:[%s237_s19] sm:$0xff] (%p36_p5), %v274_v0  ;;  %277 = vst [vmem:[%s237_s19 + $0x8] sm:$0xff] (%p36_p5), %v276_v1  ;;  %v280_v3 = vld [vmem:[%s239_s18 + $0x30] sm:$0xff] (%p36_p5) }
  0x16   : > { %279 = vst [vmem:[%s237_s19 + $0x10] sm:$0xff] %v278_v2  ;;  %281 = vst [vmem:[%s237_s19 + $0x18] sm:$0xff] %v280_v3 }
  0x17 PF: > { %p810_p10 = scmp.ge.s32.totalorder %s1022_s27, 1  ;;  %p286_p11 = scmp.lt.s32.totalorder %s1022_s27, 3 }
  0x19   : > { %p287_p12 = pnand %p810_p10, %p286_p11 }
  0x1a   : > { %s1125_s20 = sand.u32 (!%p287_p12), 1, %s1014_s25   ;;  %s828_s19 = sshll.u32 (!%p287_p12), %s804_s28, 6 }
  0x1b   : > { %290 = sbr.rel (%p287_p12) target bundleno = 693 (0x2b5), region = 82  ;;  %s811_s21 = sshll.u32 (!%p287_p12), %s1125_s20, 5 }
  0x1c   : > { %s295_s29 = scalar_lea.vmem (!%p287_p12), [#allocation2], %s811_s21  ;;  %s812_s18 = sshll.u32 (!%p287_p12), %s1125_s20, 2 }
  0x1d   : > { %s323_s21 = scalar_lea.vmem (!%p287_p12), [#allocation3], %s812_s18  ;;  %s1241_s8 = scalar_lea.hbm (!%p287_p12), %s1285_s7, %s828_s19 }
  0x1e   : > { %s740_s22 = sshll.u32 (!%p287_p12), %s323_s21, 4  ;;  %s727_s9 = scalar_lea.sflag (!%p287_p12), [#allocation4], %s1125_s20  ;;  %s741_s22 = int_to_ptr.vmem [resolvable:$true] %s740_s22 }
  0x1f   : > { %s962_s13 = scalar_lea.vmem (!%p287_p12), %s741_s22, 64  ;;  %s1027_s28 = smov (!%p287_p12), [#allocation3]  }
  0x20   : > { %v1024_v4 = vmov 0.0   ;;  %vm1025_vm0 = vmmov 0   ;;  %v1026_v5 = vmov 0   ;;  %v341_v6 = vld [vmem:[%s1280_s2 + $0x30] sm:$0x3]  ;;  %v327_v7 = vld [vmem:[%s295_s29 + $0x18] sm:$0xff]  ;;  %p963_p13 = scmp.ne.s32.totalorder %s741_s22, %s962_s13 }
  0x21   : > { %858 = vmatprep.subr.mxu0 %v1024_v4  ;;  %866 = vmatprep.mubr.msk.f32.mxu0 %vm1025_vm0, %v1024_v4  ;;  %v326_v8 = vld [vmem:[%s295_s29 + $0x10] sm:$0xff]  ;;  %v340_v9 = vld [vmem:[%s1280_s2 + $0x28] sm:$0xff]  ;;  %v339_v10 = vld [vmem:[%s1280_s2 + $0x20] sm:$0xff]  ;;  %vm377_vm1 = vcmask 261120   ;;  %vm534_vm2 = vcmask 408576   ;;  %vm547_vm3 = vcmask 1041408  }
  0x22   : > { %960 = vset.pattern.permute.xlu0 %v1026_v5  ;;  %961 = vset.pattern.permute.xlu1 %v1026_v5  ;;  %v325_v11 = vld [vmem:[%s295_s29 + $0x8] sm:$0xff]  ;;  %v338_v12 = vld [vmem:[%s1280_s2 + $0x18] sm:$0xff]  ;;  %v324_v13 = vld [vmem:[%s295_s29] sm:$0xff]  ;;  %vm651_vm4 = vcmask 1040384   ;;  %vm647_vm5 = vcmask 203776   ;;  %p964_p0 = pnand %p963_p13, %p1106_p6  ;;  %s966_s14 = sshll.u32 %s1027_s28, 4  ;;  %s967_s14 = int_to_ptr.vmem [resolvable:$false] %s966_s14 }
  0x23   : > { %374 = vperm.xlu0 %960, %v341_v6   ;;  %859 = vmatpush3.msra.mxu0 %v327_v7  ;;  %v328_v14 = vld [vmem:[%s1279_s1] sm:$0xff]  ;;  %v337_v15 = vld [vmem:[%s1280_s2 + $0x10] sm:$0xff]  ;;  %v336_v16 = vld [vmem:[%s1280_s2 + $0x8] sm:$0xff]  ;;  %s968_s15 = scalar_lea.vmem %s967_s14, 128  ;;  %p969_p2 = scmp.lt.s32.totalorder %s741_s22, %s967_s14 }
  0x24   : > { %860 = vmatprep.subr.mxu0 %v1024_v4  ;;  %364 = vperm.xlu1 %961, %v339_v10   ;;  %v329_v17 = vld [vmem:[%s1279_s1 + $0x8] sm:$0xff]  ;;  %v335_v18 = vld [vmem:[%s1280_s2] sm:$0xff]  ;;  %v513_v19 = vld [vmem:[%s1282_s4 + $0x18] sm:$0x1]  ;;  %p965_p1 = pneg %p964_p0  ;;  %p970_p3 = scmp.lt.s32.totalorder %s968_s15, %s962_s13 }
  0x25   : > { %861 = vmatpush3.msra.mxu0 %v326_v8  ;;  %v330_v20 = vld [vmem:[%s1279_s1 + $0x10] sm:$0xff]  ;;  %v511_v22 = vld [vmem:[%s1282_s4 + $0x8] sm:$0xff]  ;;  %v331_v23 = vld [vmem:[%s1279_s1 + $0x18] sm:$0xff] }
  0x26   : > { %862 = vmatprep.subr.mxu0 %v1024_v4  ;;  %v512_v21 = vld [vmem:[%s1282_s4 + $0x10] sm:$0xff]  ;;  %v510_v24 = vld [vmem:[%s1282_s4] sm:$0xff]  ;;  %v333_v27 = vld [vmem:[%s1279_s1 + $0x28] sm:$0xff]  ;;  %p971_p4 = por %p970_p3, %p969_p2 }
  0x27   : > { %369 = vperm.xlu0 %960, %v340_v9   ;;  %863 = vmatpush3.msra.mxu0 %v325_v11  ;;  %v641_v25 = vld [vmem:[%s1284_s6] sm:$0xf]  ;;  %v334_v28 = vld [vmem:[%s1279_s1 + $0x30] sm:$0x3]  ;;  %v507_v1 = vld [vmem:[%s1281_s3 + $0x8] sm:$0xff] }
  0x28   : > { %864 = vmatprep.subr.mxu0 %v1024_v4  ;;  %359 = vperm.xlu1 %961, %v338_v12   ;;  %v332_v26 = vld [vmem:[%s1279_s1 + $0x20] sm:$0xff]  ;;  %v508_v2 = vld [vmem:[%s1281_s3 + $0x10] sm:$0xff]  ;;  %v509_v3 = vld [vmem:[%s1281_s3 + $0x18] sm:$0x1]  ;;  %p972_p5 = pnand %p971_p4, %p965_p1 }
  0x29   : > { %865 = vmatpush3.msra.mxu0 %v324_v13  ;;  %v506_v29 = vld [vmem:[%s1281_s3] sm:$0xff] }
  0x2a   : > { %867 = vmatmul.mubr.msk.f32.vlgmr.msra.gmra.mxu0 %vm377_vm1, %v328_v14  ;;  %901 = vmatprep.mubr.msk.f32.mxu1 %vm534_vm2, %v506_v29 }
  0x2b   : > { %354 = vperm.xlu0 %960, %v337_v15   ;;  %869 = vmatprep.mubr.msk.f32.mxu0 %vm1025_vm0, %v1024_v4 }
  0x2c   : > { %349 = vperm.xlu1 %961, %v336_v16  }
  0x2e   : > { %870 = vmatmul.mubr.msk.f32.gmra.mxu0 %vm377_vm1, %v329_v17 }
  0x2f   : > { %344 = vperm.xlu0 %960, %v335_v18   ;;  %872 = vmatprep.mubr.msk.f32.mxu0 %vm1025_vm0, %v1024_v4 }
  0x30   : > { %531 = vperm.xlu1 %961, %v513_v19  }
  0x32   : > { %873 = vmatmul.mubr.msk.f32.gmra.mxu0 %vm377_vm1, %v330_v20 }
  0x33   : > { %526 = vperm.xlu0 %960, %v512_v21   ;;  %875 = vmatprep.mubr.msk.f32.mxu0 %vm1025_vm0, %v1024_v4  ;;  %v640_v21 = vld [vmem:[%s1283_s5] sm:$0xf] }
  0x34   : > { %521 = vperm.xlu1 %961, %v511_v22  }
  0x36   : > { %876 = vmatmul.mubr.msk.f32.gmra.mxu0 %vm377_vm1, %v331_v23 }
  0x37   : > { %516 = vperm.xlu0 %960, %v510_v24   ;;  %878 = vmatprep.mubr.msk.f32.mxu0 %vm1025_vm0, %v1024_v4 }
  0x38   : > { %644 = vperm.xlu1 %961, %v641_v25  }
  0x3a   : > { %879 = vmatmul.mubr.msk.f32.gmra.mxu0 %vm377_vm1, %v332_v26 }
  0x3b   : > { %881 = vmatprep.mubr.msk.f32.mxu0 %vm1025_vm0, %v1024_v4 }
  0x3e   : > { %882 = vmatmul.mubr.msk.f32.gmra.mxu0 %vm377_vm1, %v333_v27 }
  0x3f   : > { %884 = vmatprep.mubr.msk.f32.mxu0 %vm1025_vm0, %v1024_v4 }
  0x42   : > { %885 = vmatmul.mubr.msk.f32.gmra.mxu0 %vm377_vm1, %v334_v28 }
  0x9e   : > { %v375_v37 = vpop.permute.xlu0 %374 }
  0x9f   : > { %v365_v40 = vpop.permute.xlu1 %364 }
  0xa2   : > { %v370_v42 = vpop.permute.xlu0 %369 }
  0xa3   : > { %v360_v45 = vpop.permute.xlu1 %359 }
  0xa6   : > { %v355_v49 = vpop.permute.xlu0 %354 }
  0xa7   : > { %v350_v55 = vpop.permute.xlu1 %349 }
  0xaa   : > { %v345_v58 = vpop.permute.xlu0 %344 }
  0xab   : > { %v532_v5 = vpop.permute.xlu1 %531 }
  0xae   : > { %v527_v7 = vpop.permute.xlu0 %526 }
  0xaf   : > { %v522_v11 = vpop.permute.xlu1 %521 }
  0xb2   : > { %v517_v16 = vpop.permute.xlu0 %516 }
  0xb3   : > { %v645_v22 = vpop.permute.xlu1 %644 }
  0xea   : > { %v465_v30 = vpop.f32.mrf.mxu0 }
  0xeb   : > { %v466_v61 = vadd.f32 %v465_v30, %v345_v58 }
  0xec   : > { %v868_v31 = vpop.f32.mrf.mxu0 }
  0xed   : > { %v499_v0 = vmax.f32 %v466_v61, 0.0 }
  0xee   : > { %v470_v32 = vpop.f32.mrf.mxu0 }
  0xef   : > { %v471_v59 = vadd.f32 %v470_v32, %v350_v55 }
  0xf0   : > { %v871_v33 = vpop.f32.mrf.mxu0 }
  0xf1   : > { %v500_v63 = vmax.f32 %v471_v59, 0.0 }
  0xf2   : > { %v475_v34 = vpop.f32.mrf.mxu0 }
  0xf3   : > { %v476_v56 = vadd.f32 %v475_v34, %v355_v49 }
  0xf4   : > { %v874_v35 = vpop.f32.mrf.mxu0 }
  0xf5   : > { %v501_v62 = vmax.f32 %v476_v56, 0.0 }
  0xf6   : > { %v480_v36 = vpop.f32.mrf.mxu0 }
  0xf7   : > { %v481_v53 = vadd.f32 %v480_v36, %v360_v45 }
  0xf8   : > { %v877_v38 = vpop.f32.mrf.mxu0 }
  0xf9   : > { %v502_v60 = vmax.f32 %v481_v53, 0.0 }
  0xfa   : > { %v485_v39 = vpop.f32.mrf.mxu0 }
  0xfb   : > { %v486_v51 = vadd.f32 %v485_v39, %v365_v40 }
  0xfc   : > { %v880_v41 = vpop.f32.mrf.mxu0 }
  0xfd   : > { %v503_v57 = vmax.f32 %v486_v51, 0.0 }
  0xfe   : > { %v490_v43 = vpop.f32.mrf.mxu0 }
  0xff   : > { %v491_v47 = vadd.f32 %v490_v43, %v370_v42 }
 0x100   : > { %v883_v44 = vpop.f32.mrf.mxu0 }
 0x101   : > { %v504_v54 = vmax.f32 %v491_v47, 0.0 }
 0x102   : > { %v495_v46 = vpop.f32.mrf.mxu0 }
 0x103   : > { %v496_v48 = vadd.f32 %v495_v46, %v375_v37 }
 0x104   : > { %v886_v50 = vpop.f32.mrf.mxu0 }
 0x105   : > { %v505_v52 = vmax.f32 %v496_v48, 0.0 }
 0x107   : > { %887 = vmatprep.subr.msk.mxu1 %vm547_vm3, %v505_v52 }
 0x108   : > { %888 = vmatpush3.msk.msra.mxu1 %vm547_vm3, %v505_v52 }
 0x109   : > { %889 = vmatprep.subr.mxu1 %v504_v54 }
 0x10a   : > { %890 = vmatpush3.msra.mxu1 %v504_v54 }
 0x10b   : > { %891 = vmatprep.subr.mxu1 %v503_v57 }
 0x10c   : > { %892 = vmatpush3.msra.mxu1 %v503_v57 }
 0x10d   : > { %893 = vmatprep.subr.mxu1 %v502_v60 }
 0x10e   : > { %894 = vmatpush3.msra.mxu1 %v502_v60 }
 0x10f   : > { %895 = vmatprep.subr.mxu1 %v501_v62 }
 0x110   : > { %896 = vmatpush3.msra.mxu1 %v501_v62 }
 0x111   : > { %897 = vmatprep.subr.mxu1 %v500_v63 }
 0x112   : > { %898 = vmatpush3.msra.mxu1 %v500_v63 }
 0x113   : > { %899 = vmatprep.subr.mxu1 %v499_v0 }
 0x114   : > { %900 = vmatpush3.msra.mxu1 %v499_v0 }
 0x115   : > { %902 = vmatmul.mubr.msk.f32.vlgmr.msra.gmra.mxu1 %vm534_vm2, %v507_v1  ;;  %907 = vmatprep.subr.mxu1 %v1024_v4 }
 0x116   : > { %904 = vmatprep.mubr.msk.f32.mxu1 %vm534_vm2, %v508_v2 }
 0x119   : > { %905 = vmatmul.mubr.msk.f32.gmra.mxu1 %vm534_vm2, %v509_v3 }
 0x11a   : > { %915 = vmatprep.mubr.msk.f32.mxu1 %vm1025_vm0, %v1024_v4 }
 0x1d5   : > { %v903_v6 = vpop.f32.mrf.mxu1 }
 0x1d6   : > { %v623_v13 = vadd.f32 %v903_v6, %v522_v11 }
 0x1d7   : > { %v617_v8 = vpop.f32.mrf.mxu1 }
 0x1d8   : > { %v618_v17 = vadd.f32 %v617_v8, %v517_v16  ;;  %v637_v19 = vmax.f32 %v623_v13, 0.0 }
 0x1d9   : > { %v906_v9 = vpop.f32.mrf.mxu1 }
 0x1da   : > { %v633_v10 = vadd.f32 %v906_v9, %v532_v5  ;;  %v636_v20 = vmax.f32 %v618_v17, 0.0 }
 0x1db   : > { %v627_v12 = vpop.f32.mrf.mxu1 }
 0x1dc   : > { %v639_v14 = vmax.f32 %v633_v10, 0.0  ;;  %v628_v15 = vadd.f32 %v627_v12, %v527_v7 }
 0x1de   : > { %v638_v18 = vmax.f32 %v628_v15, 0.0  ;;  %908 = vmatpush3.msk.msra.mxu1 %vm651_vm4, %v639_v14 }
 0x1df   : > { %909 = vmatprep.subr.mxu1 %v1024_v4 }
 0x1e0   : > { %910 = vmatpush3.msra.mxu1 %v638_v18 }
 0x1e1   : > { %911 = vmatprep.subr.mxu1 %v1024_v4 }
 0x1e2   : > { %912 = vmatpush3.msra.mxu1 %v637_v19 }
 0x1e3   : > { %913 = vmatprep.subr.mxu1 %v1024_v4 }
 0x1e4   : > { %914 = vmatpush3.msra.mxu1 %v636_v20 }
 0x1e5   : > { %916 = vmatmul.mubr.msk.f32.vlgmr.msra.gmra.mxu1 %vm647_vm5, %v640_v21 }
 0x2a5   : > { %v721_v23 = vpop.f32.mrf.mxu1 }
 0x2a6   : > { %v722_v24 = vadd.f32 %v721_v23, %v645_v22 }
 0x2a7   : > { %v917_v25 = vpop.f32.mrf.mxu1 }
 0x2a8   : > { %725 = vst [vmem:[%s323_s21] sm:$0xf] %v722_v24 }
 0x2a9   : > { %975 = shalt.err (!%p972_p5)
}
 0x2aa   : > { %s976_s16 = scalar_lea.hbm %s1241_s8, 64  ;;  %s980_s18 = scalar_lea.hbm %s1285_s7, 128 }
 0x2ab   : > { %p977_p7 = scmp.ne.s32.totalorder %s1241_s8, %s976_s16  ;;  %p981_p12 = scmp.lt.s32.totalorder %s1241_s8, %s1285_s7 }
 0x2ac   : > { %p982_p13 = scmp.lt.s32.totalorder %s980_s18, %s976_s16 }
 0x2ad   : > { %p978_p10 = pnand %p977_p7, %p1106_p6 }
 0x2ae   : > { %p983_p0 = por %p982_p13, %p981_p12 }
 0x2af   : > { %p979_p11 = pneg %p978_p10 }
 0x2b1   : > { %p984_p1 = pnand %p983_p0, %p979_p11 }
 0x2b3   : > { %987 = shalt.err (!%p984_p1)
}
 0x2b4   : > { %918 = dma.vmem_to_hbm [thread:$0]  (%p1106_p6), %s741_s22, 64, %s1241_s8, %s727_s9  }
 0x2b5 PF: > { %s752_s23 = sand.u32 1, %s1010_s24   ;;  %p921_p2 = pnand %p807_p9, %p1110_p8 }
 0x2b6   : > { %s753_s29 = scalar_lea.sflag [#allocation4], %s752_s23 }
 0x2b7   : > { %p922_p3 = pneg %p921_p2 }
 0x2b9   : > { %1005 = dma.done.wait (%p922_p3), %s753_s29, 64  }
 0x2ba   : > { %1007 = vsyncadd (%p922_p3), %s753_s29, 4294967232  ;;  %p17_p4 = scmp.ge.s32.totalorder %s1091_s30, 4   ;;  %s1288_s24 = smov %s1014_s25 }
 0x2bb   : > { %s1289_s25 = smov %s1018_s26  ;;  %s1290_s26 = smov %s1104_s10 }
 0x2bc   : > { %s1291_s27 = smov %s1091_s30  ;;  %19 = sbr.rel (!%p17_p4) target bundleno = 3 (0x3), region = 126 }
 0x2c1   :  { %758 = vsyncpa [#allocation4], 1 }
 0x2c2   :  { %760 = vsyncpa [#allocation4 + $0x1], 1 }

</bundles_post_ra>
